<compile_context>
chip_gen: v7x
topology: tpu7x:2x2x1
jax: 0.10.0
libtpu: 0.0.40
codegen_flags: <defaults>
</compile_context>

<pallas_src>
import functools

import jax
import jax.numpy as jnp
import numpy as np
from jax import lax
from jax.experimental import pallas as pl
from jax.experimental.pallas import tpu as pltpu


def _cross_attn_kernel(num_heads,
                       vid_cl_ref,   # (1, C, Lq) f32  video tokens, channel-major (query src + residual)
                       a_el_ref,     # (1, E, Lk) bf16 audio a_flat tokens, feature-major (K/V source)
                       wq_ref,       # (E, C) bf16  fused  scale * (Wq @ W_video_proj)
                       bq_ref,       # (E, 1) f32   scale * bq
                       wk_ref,       # (E, E) bf16  Wk
                       bk_ref,       # (E, 1) f32
                       wv_ref,       # (E, E) bf16  Wv
                       bv_ref,       # (E, 1) f32
                       wo_ref,       # (C, E) bf16  fused  W_out_conv @ Wo
                       bo_ref,       # (C, 1) f32   fused  W_out_conv @ bo
                       o_ref,        # (1, C, Lq) f32
                       o_acc):       # (E, Lq) f32 VMEM scratch: per-head attention outputs
    x_cl = vid_cl_ref[0]                                   # (C, Lq) f32
    a_el = a_el_ref[0]                                     # (E, Lk) bf16
    E = wk_ref.shape[0]
    hd = E // num_heads

    # Projections, all feature-major (features on sublanes, tokens on lanes); bf16 MXU, f32 acc.
    q_t = jnp.dot(wq_ref[...], x_cl.astype(jnp.bfloat16),
                  preferred_element_type=jnp.float32) + bq_ref[...]   # (E, Lq)  (scale folded in)
    k_t = jnp.dot(wk_ref[...], a_el,
                  preferred_element_type=jnp.float32) + bk_ref[...]   # (E, Lk)
    v_t = jnp.dot(wv_ref[...], a_el,
                  preferred_element_type=jnp.float32) + bv_ref[...]   # (E, Lk)

    for h in range(num_heads):            # static unroll; sublane-aligned hd-row f32 slices
        lo = h * hd
        qh = q_t[lo:lo + hd, :].astype(jnp.bfloat16)       # (hd, Lq)
        kh = k_t[lo:lo + hd, :].astype(jnp.bfloat16)       # (hd, Lk)
        vh = v_t[lo:lo + hd, :].astype(jnp.bfloat16)       # (hd, Lk)

        # Scores: contract the head dim (axis 0 of both) -> (Lk, Lq); no in-kernel transposes.
        # TODO(synk): at production L this (Lk, Lq) f32 tile needs an Lk-tiled online softmax.
        s = lax.dot_general(kh, qh, (((0,), (0,)), ((), ())),
                            preferred_element_type=jnp.float32)
        s = s - jnp.max(s, axis=0, keepdims=True)
        p = jnp.exp(s)                                                     # (Lk, Lq) f32
        inv_l = pl.reciprocal(jnp.sum(p, axis=0, keepdims=True), approx=True)   # (1, Lq)
        # Deferred normalization: scale the small (hd, Lq) PV result, not the (Lk, Lq) probs.
        oh = jnp.dot(vh, p.astype(jnp.bfloat16),
                     preferred_element_type=jnp.float32) * inv_l           # (hd, Lq)
        o_acc[lo:lo + hd, :] = oh

    # One contraction-E fused (output conv ∘ MHA out_proj) matmul + fused bias + residual.
    o_ref[0] = (x_cl + bo_ref[...]
                + jnp.dot(wo_ref[...], o_acc[...].astype(jnp.bfloat16),
                          preferred_element_type=jnp.float32))


def cross_attention_block(video_feat, audio_feat, params, num_heads):
    B, C, T, H, W = video_feat.shape
    E = params["audio_proj_w"].shape[0]
    L = T * H * W
    assert E % num_heads == 0, "embed_dim must be divisible by num_heads"
    hd = E // num_heads
    scale = float(hd) ** -0.5

    w_vid = params["video_proj_w"].reshape(E, C)    # Conv3d(C->E, k=1, bias=False)
    w_aud = params["audio_proj_w"]                  # (E, A), bias=False
    w_in = params["in_proj_w"]                      # (3E, E)
    b_in = params["in_proj_b"]                      # (3E,)
    w_o = params["attn_out_w"]                      # (E, E)
    b_o = params["attn_out_b"]                      # (E,)
    w_out = params["out_proj_w"].reshape(C, E)      # Conv3d(E->C, k=1, bias=False)

    wq, wk, wv = w_in[:E], w_in[E:2 * E], w_in[2 * E:]
    bq, bk, bv = b_in[:E], b_in[E:2 * E], b_in[2 * E:]

    # ---- host-side operator fusions (done once); bf16 weights for the MXU, f32 biases ----
    wq_f = ((wq @ w_vid) * scale).astype(jnp.bfloat16)   # (E, C): video_proj + Q proj + scale
    bq_f = (bq * scale).reshape(E, 1)
    wk_m = wk.astype(jnp.bfloat16)                       # (E, E): k_t = Wk @ a_el
    bk_c = bk.reshape(E, 1)
    wv_m = wv.astype(jnp.bfloat16)                       # (E, E): v_t = Wv @ a_el
    bv_c = bv.reshape(E, 1)
    wo_f = (w_out @ w_o).astype(jnp.bfloat16)            # (C, E): out conv ∘ MHA out_proj
    bo_f = (w_out @ b_o).reshape(C, 1)

    # ---- layout plumbing (all outside the kernel) ----
    video_cl = video_feat.reshape(B, C, L)               # free reshape, (B, C, L) f32
    a_emb = audio_feat @ w_aud.T                         # (B, T, E)
    # Faithful to the module: expand to (B,T,E,H,W) then row-major view to (B, L, E).
    # NOTE: this view (no permute) intermixes E with (H, W); the L keys are NOT replicas of the
    # T audio embeddings, so the Lk=T dedup suggested in review would change semantics -> skipped.
    a_flat = jnp.broadcast_to(a_emb[:, :, :, None, None],
                              (B, T, E, H, W)).reshape(B, L, E)
    # Ship the audio K/V source once, feature-major and bf16 (used only as an MXU operand).
    a_el = a_flat.transpose(0, 2, 1).astype(jnp.bfloat16)      # (B, E, L)

    # Lq (query-token) tiling: multiple of 128 when L allows it (lane-dense output, bounded VMEM
    # on v7x, >B parallel steps for megacore); degenerates to one full-L tile at toy sizes.
    lq = next((c for c in (1024, 512, 256, 128) if L % c == 0), L)
    n_q = L // lq

    vid_spec = pl.BlockSpec((1, C, lq), lambda b, q: (b, 0, q))
    audio_spec = pl.BlockSpec((1, E, L), lambda b, q: (b, 0, 0))

    def const_spec(shape):
        # TODO(synk): at production E/C single-buffer these constant blocks
        # (pipeline_mode=pl.Buffered(1)) or K/N-tile them for v7x's 64 MiB VMEM.
        return pl.BlockSpec(shape, lambda b, q: (0, 0))

    kernel = functools.partial(_cross_attn_kernel, num_heads)

    # Advisory cost estimate so XLA schedules the surrounding ops around the custom call.
    flops = int(B * (2 * L * E * C                 # Q projection
                     + n_q * 4 * E * E * L         # K/V projections (recomputed per Lq tile)
                     + 4 * E * L * L               # scores + PV over all heads
                     + 2 * C * E * L))             # fused output projection
    transcendentals = int(B * num_heads * L * L)
    weight_bytes = ((wq_f.size + wk_m.size + wv_m.size + wo_f.size) * 2
                    + (bq_f.size + bk_c.size + bv_c.size + bo_f.size) * 4)
    bytes_accessed = int(2 * B * C * L * 4 + B * n_q * E * L * 2 + B * n_q * weight_bytes)

    out_cl = pl.pallas_call(
        kernel,
        out_shape=jax.ShapeDtypeStruct((B, C, L), jnp.float32),
        grid=(B, n_q),
        in_specs=[vid_spec, audio_spec,
                  const_spec((E, C)), const_spec((E, 1)),
                  const_spec((E, E)), const_spec((E, 1)),
                  const_spec((E, E)), const_spec((E, 1)),
                  const_spec((C, E)), const_spec((C, 1))],
        out_specs=pl.BlockSpec((1, C, lq), lambda b, q: (b, 0, q)),
        scratch_shapes=[pltpu.VMEM((E, lq), jnp.float32)],
        compiler_params=pltpu.CompilerParams(
            dimension_semantics=("parallel", "parallel")),
        cost_estimate=pl.CostEstimate(flops=flops,
                                      transcendentals=transcendentals,
                                      bytes_accessed=bytes_accessed),
    )(video_cl, a_el, wq_f, bq_f, wk_m, bk_c, wv_m, bv_c, wo_f, bo_f)

    return out_cl.reshape(B, C, T, H, W)


def make_params(key, C, A, E):
    ks = jax.random.split(key, 7)
    s = 0.1
    return dict(
        video_proj_w=jax.random.normal(ks[0], (E, C, 1, 1, 1), jnp.float32) * s,
        audio_proj_w=jax.random.normal(ks[1], (E, A), jnp.float32) * s,
        in_proj_w=jax.random.normal(ks[2], (3 * E, E), jnp.float32) * s,
        in_proj_b=jax.random.normal(ks[3], (3 * E,), jnp.float32) * s,
        attn_out_w=jax.random.normal(ks[4], (E, E), jnp.float32) * s,
        attn_out_b=jax.random.normal(ks[5], (E,), jnp.float32) * s,
        out_proj_w=jax.random.normal(ks[6], (C, E, 1, 1, 1), jnp.float32) * s,
    )


def reference(video_feat, audio_feat, params, num_heads):
    """Pure-JAX (f32) mirror of the PyTorch CrossAttentionBlock.forward."""
    B, C, T, H, W = video_feat.shape
    E = params["audio_proj_w"].shape[0]
    L = T * H * W
    hd = E // num_heads
    w_vid = params["video_proj_w"].reshape(E, C)
    w_out = params["out_proj_w"].reshape(C, E)

    v_emb = jnp.einsum("ec,bcthw->bethw", w_vid, video_feat)
    v_flat = v_emb.reshape(B, E, L).transpose(0, 2, 1)              # (B, L, E)
    a_emb = audio_feat @ params["audio_proj_w"].T                   # (B, T, E)
    a_flat = jnp.broadcast_to(a_emb[:, :, :, None, None],
                              (B, T, E, H, W)).reshape(B, L, E)

    w_in, b_in = params["in_proj_w"], params["in_proj_b"]
    q = v_flat @ w_in[:E].T + b_in[:E]
    k = a_flat @ w_in[E:2 * E].T + b_in[E:2 * E]
    v = a_flat @ w_in[2 * E:].T + b_in[2 * E:]

    def split(t):
        return t.reshape(B, L, num_heads, hd).transpose(0, 2, 1, 3)

    qh, kh, vh = split(q), split(k), split(v)
    s = jnp.einsum("bhqd,bhkd->bhqk", qh, kh) * (float(hd) ** -0.5)
    p = jax.nn.softmax(s, axis=-1)
    o = jnp.einsum("bhqk,bhkd->bhqd", p, vh).transpose(0, 2, 1, 3).reshape(B, L, E)
    attn = o @ params["attn_out_w"].T + params["attn_out_b"]        # (B, L, E)
    attn_vol = attn.transpose(0, 2, 1).reshape(B, E, T, H, W)
    out = jnp.einsum("ce,bethw->bcthw", w_out, attn_vol)
    return out + video_feat


if __name__ == "__main__":
    B, C, T, H, W = 2, 4, 4, 4, 4        # video feature map: (2, 4, 4, 4, 4), L = 64 query tokens
    A, E, NH = 16, 32, 4                 # audio_dim=16, embed_dim=32, num_heads=4

    key = jax.random.PRNGKey(0)
    kv_key, ka_key, kp_key = jax.random.split(key, 3)
    video = jax.random.normal(kv_key, (B, C, T, H, W), jnp.float32)
    audio = jax.random.normal(ka_key, (B, T, A), jnp.float32)
    params = make_params(kp_key, C, A, E)

    out = jax.block_until_ready(cross_attention_block(video, audio, params, NH))
    ref = jax.block_until_ready(reference(video, audio, params, NH))

    assert out.shape == video.shape
    # bf16 MXU operands + approx reciprocal (per perf review) loosen parity vs the f32 reference.
    np.testing.assert_allclose(np.asarray(out), np.asarray(ref), atol=1e-2, rtol=1e-2)
    print("KERNEL_OK")
</pallas_src>

<mosaic_0001>
module attributes {stable_mosaic.version = 11 : i64} {
  func.func @_cross_attn_kernel(%arg0: i32, %arg1: i32, %arg2: memref<1x4x64xf32, #tpu.memory_space<vmem>>, %arg3: memref<1x32x64xbf16, #tpu.memory_space<vmem>>, %arg4: memref<32x4xbf16, #tpu.memory_space<vmem>>, %arg5: memref<32x1xf32, #tpu.memory_space<vmem>>, %arg6: memref<32x32xbf16, #tpu.memory_space<vmem>>, %arg7: memref<32x1xf32, #tpu.memory_space<vmem>>, %arg8: memref<32x32xbf16, #tpu.memory_space<vmem>>, %arg9: memref<32x1xf32, #tpu.memory_space<vmem>>, %arg10: memref<4x32xbf16, #tpu.memory_space<vmem>>, %arg11: memref<4x1xf32, #tpu.memory_space<vmem>>, %arg12: memref<1x4x64xf32, #tpu.memory_space<vmem>>, %arg13: memref<32x64xf32, #tpu.memory_space<vmem>>) attributes {dimension_semantics = [#tpu.dimension_semantics<parallel>, #tpu.dimension_semantics<parallel>], iteration_bounds = array<i64: 2, 1>, scalar_prefetch = 0 : i64, scratch_operands = 1 : i64, tpu.core_type = #tpu.core_type<tc>, window_params = [{transform_indices = @transform_0, window_bounds = array<i64: 1, 4, 64>}, {transform_indices = @transform_1, window_bounds = array<i64: 1, 32, 64>}, {pipeline_mode = #tpu.pipeline_mode<synchronous>, transform_indices = @transform_2, window_bounds = array<i64: 32, 4>}, {pipeline_mode = #tpu.pipeline_mode<synchronous>, transform_indices = @transform_3, window_bounds = array<i64: 32, 1>}, {pipeline_mode = #tpu.pipeline_mode<synchronous>, transform_indices = @transform_4, window_bounds = array<i64: 32, 32>}, {pipeline_mode = #tpu.pipeline_mode<synchronous>, transform_indices = @transform_5, window_bounds = array<i64: 32, 1>}, {pipeline_mode = #tpu.pipeline_mode<synchronous>, transform_indices = @transform_6, window_bounds = array<i64: 32, 32>}, {pipeline_mode = #tpu.pipeline_mode<synchronous>, transform_indices = @transform_7, window_bounds = array<i64: 32, 1>}, {pipeline_mode = #tpu.pipeline_mode<synchronous>, transform_indices = @transform_8, window_bounds = array<i64: 4, 32>}, {pipeline_mode = #tpu.pipeline_mode<synchronous>, transform_indices = @transform_9, window_bounds = array<i64: 4, 1>}, {transform_indices = @transform_10, window_bounds = array<i64: 1, 4, 64>}]} {
    %c0 = arith.constant 0 : index
    %c0_0 = arith.constant 0 : index
    %c0_1 = arith.constant 0 : index
    %0 = vector.load %arg2[%c0, %c0_0, %c0_1] : memref<1x4x64xf32, #tpu.memory_space<vmem>>, vector<1x4x64xf32>
    %1 = vector.shape_cast %0 : vector<1x4x64xf32> to vector<4x64xf32>
    %c0_2 = arith.constant 0 : index
    %c0_3 = arith.constant 0 : index
    %c0_4 = arith.constant 0 : index
    %2 = vector.load %arg3[%c0_2, %c0_3, %c0_4] : memref<1x32x64xbf16, #tpu.memory_space<vmem>>, vector<1x32x64xbf16>
    %3 = vector.shape_cast %2 : vector<1x32x64xbf16> to vector<32x64xbf16>
    %c0_5 = arith.constant 0 : index
    %c0_6 = arith.constant 0 : index
    %4 = vector.load %arg4[%c0_5, %c0_6] : memref<32x4xbf16, #tpu.memory_space<vmem>>, vector<32x4xbf16>
    %5 = arith.truncf %1 : vector<4x64xf32> to vector<4x64xbf16>
    %cst = arith.constant dense<0.000000e+00> : vector<32x64xf32>
    %6 = tpu.matmul %4, %5, %cst {dimension_numbers = #tpu.dot_dimension_numbers<[1], [0], [0], [1], [0, 0, 1, 1], [], []>} : vector<32x4xbf16>, vector<4x64xbf16>, vector<32x64xf32> -> vector<32x64xf32>
    %c0_7 = arith.constant 0 : index
    %c0_8 = arith.constant 0 : index
    %7 = vector.load %arg5[%c0_7, %c0_8] : memref<32x1xf32, #tpu.memory_space<vmem>>, vector<32x1xf32>
    %8 = vector.broadcast %7 : vector<32x1xf32> to vector<32x64xf32>
    %9 = arith.addf %6, %8 : vector<32x64xf32>
    %c0_9 = arith.constant 0 : index
    %c0_10 = arith.constant 0 : index
    %10 = vector.load %arg6[%c0_9, %c0_10] : memref<32x32xbf16, #tpu.memory_space<vmem>>, vector<32x32xbf16>
    %cst_11 = arith.constant dense<0.000000e+00> : vector<32x64xf32>
    %11 = tpu.matmul %10, %3, %cst_11 {dimension_numbers = #tpu.dot_dimension_numbers<[1], [0], [0], [1], [0, 0, 1, 1], [], []>} : vector<32x32xbf16>, vector<32x64xbf16>, vector<32x64xf32> -> vector<32x64xf32>
    %c0_12 = arith.constant 0 : index
    %c0_13 = arith.constant 0 : index
    %12 = vector.load %arg7[%c0_12, %c0_13] : memref<32x1xf32, #tpu.memory_space<vmem>>, vector<32x1xf32>
    %13 = vector.broadcast %12 : vector<32x1xf32> to vector<32x64xf32>
    %14 = arith.addf %11, %13 : vector<32x64xf32>
    %c0_14 = arith.constant 0 : index
    %c0_15 = arith.constant 0 : index
    %15 = vector.load %arg8[%c0_14, %c0_15] : memref<32x32xbf16, #tpu.memory_space<vmem>>, vector<32x32xbf16>
    %cst_16 = arith.constant dense<0.000000e+00> : vector<32x64xf32>
    %16 = tpu.matmul %15, %3, %cst_16 {dimension_numbers = #tpu.dot_dimension_numbers<[1], [0], [0], [1], [0, 0, 1, 1], [], []>} : vector<32x32xbf16>, vector<32x64xbf16>, vector<32x64xf32> -> vector<32x64xf32>
    %c0_17 = arith.constant 0 : index
    %c0_18 = arith.constant 0 : index
    %17 = vector.load %arg9[%c0_17, %c0_18] : memref<32x1xf32, #tpu.memory_space<vmem>>, vector<32x1xf32>
    %18 = vector.broadcast %17 : vector<32x1xf32> to vector<32x64xf32>
    %19 = arith.addf %16, %18 : vector<32x64xf32>
    %20 = vector.extract_strided_slice %9 {offsets = [0, 0], sizes = [8, 64], strides = [1, 1]} : vector<32x64xf32> to vector<8x64xf32>
    %21 = arith.truncf %20 : vector<8x64xf32> to vector<8x64xbf16>
    %22 = vector.extract_strided_slice %14 {offsets = [0, 0], sizes = [8, 64], strides = [1, 1]} : vector<32x64xf32> to vector<8x64xf32>
    %23 = arith.truncf %22 : vector<8x64xf32> to vector<8x64xbf16>
    %24 = vector.extract_strided_slice %19 {offsets = [0, 0], sizes = [8, 64], strides = [1, 1]} : vector<32x64xf32> to vector<8x64xf32>
    %25 = arith.truncf %24 : vector<8x64xf32> to vector<8x64xbf16>
    %cst_19 = arith.constant dense<0.000000e+00> : vector<64x64xf32>
    %26 = tpu.matmul %23, %21, %cst_19 {dimension_numbers = #tpu.dot_dimension_numbers<[0], [0], [1], [1], [0, 1, 1, 1], [], []>} : vector<8x64xbf16>, vector<8x64xbf16>, vector<64x64xf32> -> vector<64x64xf32>
    %cst_20 = arith.constant dense<0xFF800000> : vector<64xf32>
    %27 = vector.multi_reduction <maximumf>, %26, %cst_20 [0] : vector<64x64xf32> to vector<64xf32>
    %28 = vector.shape_cast %27 : vector<64xf32> to vector<1x64xf32>
    %29 = vector.broadcast %28 : vector<1x64xf32> to vector<64x64xf32>
    %30 = arith.subf %26, %29 : vector<64x64xf32>
    %31 = math.exp %30 : vector<64x64xf32>
    %cst_21 = arith.constant dense<0.000000e+00> : vector<64xf32>
    %32 = vector.multi_reduction <add>, %31, %cst_21 [0] : vector<64x64xf32> to vector<64xf32>
    %33 = vector.shape_cast %32 : vector<64xf32> to vector<1x64xf32>
    %34 = tpu.reciprocal %33 {approx = true} : vector<1x64xf32> -> vector<1x64xf32>
    %35 = arith.truncf %31 : vector<64x64xf32> to vector<64x64xbf16>
    %cst_22 = arith.constant dense<0.000000e+00> : vector<8x64xf32>
    %36 = tpu.matmul %25, %35, %cst_22 {dimension_numbers = #tpu.dot_dimension_numbers<[1], [0], [0], [1], [0, 0, 1, 1], [], []>} : vector<8x64xbf16>, vector<64x64xbf16>, vector<8x64xf32> -> vector<8x64xf32>
    %37 = vector.broadcast %34 : vector<1x64xf32> to vector<8x64xf32>
    %38 = arith.mulf %36, %37 : vector<8x64xf32>
    %c0_23 = arith.constant 0 : index
    %c0_24 = arith.constant 0 : index
    %39 = vector.load %arg13[%c0_23, %c0_24] : memref<32x64xf32, #tpu.memory_space<vmem>>, vector<8x64xf32>
    tpu.vector_store %arg13[%c0_23, %c0_24], %38 {strides = array<i32>} : memref<32x64xf32, #tpu.memory_space<vmem>>, vector<8x64xf32>,
    %40 = vector.extract_strided_slice %9 {offsets = [8, 0], sizes = [8, 64], strides = [1, 1]} : vector<32x64xf32> to vector<8x64xf32>
    %41 = arith.truncf %40 : vector<8x64xf32> to vector<8x64xbf16>
    %42 = vector.extract_strided_slice %14 {offsets = [8, 0], sizes = [8, 64], strides = [1, 1]} : vector<32x64xf32> to vector<8x64xf32>
    %43 = arith.truncf %42 : vector<8x64xf32> to vector<8x64xbf16>
    %44 = vector.extract_strided_slice %19 {offsets = [8, 0], sizes = [8, 64], strides = [1, 1]} : vector<32x64xf32> to vector<8x64xf32>
    %45 = arith.truncf %44 : vector<8x64xf32> to vector<8x64xbf16>
    %cst_25 = arith.constant dense<0.000000e+00> : vector<64x64xf32>
    %46 = tpu.matmul %43, %41, %cst_25 {dimension_numbers = #tpu.dot_dimension_numbers<[0], [0], [1], [1], [0, 1, 1, 1], [], []>} : vector<8x64xbf16>, vector<8x64xbf16>, vector<64x64xf32> -> vector<64x64xf32>
    %cst_26 = arith.constant dense<0xFF800000> : vector<64xf32>
    %47 = vector.multi_reduction <maximumf>, %46, %cst_26 [0] : vector<64x64xf32> to vector<64xf32>
    %48 = vector.shape_cast %47 : vector<64xf32> to vector<1x64xf32>
    %49 = vector.broadcast %48 : vector<1x64xf32> to vector<64x64xf32>
    %50 = arith.subf %46, %49 : vector<64x64xf32>
    %51 = math.exp %50 : vector<64x64xf32>
    %cst_27 = arith.constant dense<0.000000e+00> : vector<64xf32>
    %52 = vector.multi_reduction <add>, %51, %cst_27 [0] : vector<64x64xf32> to vector<64xf32>
    %53 = vector.shape_cast %52 : vector<64xf32> to vector<1x64xf32>
    %54 = tpu.reciprocal %53 {approx = true} : vector<1x64xf32> -> vector<1x64xf32>
    %55 = arith.truncf %51 : vector<64x64xf32> to vector<64x64xbf16>
    %cst_28 = arith.constant dense<0.000000e+00> : vector<8x64xf32>
    %56 = tpu.matmul %45, %55, %cst_28 {dimension_numbers = #tpu.dot_dimension_numbers<[1], [0], [0], [1], [0, 0, 1, 1], [], []>} : vector<8x64xbf16>, vector<64x64xbf16>, vector<8x64xf32> -> vector<8x64xf32>
    %57 = vector.broadcast %54 : vector<1x64xf32> to vector<8x64xf32>
    %58 = arith.mulf %56, %57 : vector<8x64xf32>
    %c8 = arith.constant 8 : index
    %c0_29 = arith.constant 0 : index
    %59 = vector.load %arg13[%c8, %c0_29] : memref<32x64xf32, #tpu.memory_space<vmem>>, vector<8x64xf32>
    tpu.vector_store %arg13[%c8, %c0_29], %58 {strides = array<i32>} : memref<32x64xf32, #tpu.memory_space<vmem>>, vector<8x64xf32>,
    %60 = vector.extract_strided_slice %9 {offsets = [16, 0], sizes = [8, 64], strides = [1, 1]} : vector<32x64xf32> to vector<8x64xf32>
    %61 = arith.truncf %60 : vector<8x64xf32> to vector<8x64xbf16>
    %62 = vector.extract_strided_slice %14 {offsets = [16, 0], sizes = [8, 64], strides = [1, 1]} : vector<32x64xf32> to vector<8x64xf32>
    %63 = arith.truncf %62 : vector<8x64xf32> to vector<8x64xbf16>
    %64 = vector.extract_strided_slice %19 {offsets = [16, 0], sizes = [8, 64], strides = [1, 1]} : vector<32x64xf32> to vector<8x64xf32>
    %65 = arith.truncf %64 : vector<8x64xf32> to vector<8x64xbf16>
    %cst_30 = arith.constant dense<0.000000e+00> : vector<64x64xf32>
    %66 = tpu.matmul %63, %61, %cst_30 {dimension_numbers = #tpu.dot_dimension_numbers<[0], [0], [1], [1], [0, 1, 1, 1], [], []>} : vector<8x64xbf16>, vector<8x64xbf16>, vector<64x64xf32> -> vector<64x64xf32>
    %cst_31 = arith.constant dense<0xFF800000> : vector<64xf32>
    %67 = vector.multi_reduction <maximumf>, %66, %cst_31 [0] : vector<64x64xf32> to vector<64xf32>
    %68 = vector.shape_cast %67 : vector<64xf32> to vector<1x64xf32>
    %69 = vector.broadcast %68 : vector<1x64xf32> to vector<64x64xf32>
    %70 = arith.subf %66, %69 : vector<64x64xf32>
    %71 = math.exp %70 : vector<64x64xf32>
    %cst_32 = arith.constant dense<0.000000e+00> : vector<64xf32>
    %72 = vector.multi_reduction <add>, %71, %cst_32 [0] : vector<64x64xf32> to vector<64xf32>
    %73 = vector.shape_cast %72 : vector<64xf32> to vector<1x64xf32>
    %74 = tpu.reciprocal %73 {approx = true} : vector<1x64xf32> -> vector<1x64xf32>
    %75 = arith.truncf %71 : vector<64x64xf32> to vector<64x64xbf16>
    %cst_33 = arith.constant dense<0.000000e+00> : vector<8x64xf32>
    %76 = tpu.matmul %65, %75, %cst_33 {dimension_numbers = #tpu.dot_dimension_numbers<[1], [0], [0], [1], [0, 0, 1, 1], [], []>} : vector<8x64xbf16>, vector<64x64xbf16>, vector<8x64xf32> -> vector<8x64xf32>
    %77 = vector.broadcast %74 : vector<1x64xf32> to vector<8x64xf32>
    %78 = arith.mulf %76, %77 : vector<8x64xf32>
    %c16 = arith.constant 16 : index
    %c0_34 = arith.constant 0 : index
    %79 = vector.load %arg13[%c16, %c0_34] : memref<32x64xf32, #tpu.memory_space<vmem>>, vector<8x64xf32>
    tpu.vector_store %arg13[%c16, %c0_34], %78 {strides = array<i32>} : memref<32x64xf32, #tpu.memory_space<vmem>>, vector<8x64xf32>,
    %80 = vector.extract_strided_slice %9 {offsets = [24, 0], sizes = [8, 64], strides = [1, 1]} : vector<32x64xf32> to vector<8x64xf32>
    %81 = arith.truncf %80 : vector<8x64xf32> to vector<8x64xbf16>
    %82 = vector.extract_strided_slice %14 {offsets = [24, 0], sizes = [8, 64], strides = [1, 1]} : vector<32x64xf32> to vector<8x64xf32>
    %83 = arith.truncf %82 : vector<8x64xf32> to vector<8x64xbf16>
    %84 = vector.extract_strided_slice %19 {offsets = [24, 0], sizes = [8, 64], strides = [1, 1]} : vector<32x64xf32> to vector<8x64xf32>
    %85 = arith.truncf %84 : vector<8x64xf32> to vector<8x64xbf16>
    %cst_35 = arith.constant dense<0.000000e+00> : vector<64x64xf32>
    %86 = tpu.matmul %83, %81, %cst_35 {dimension_numbers = #tpu.dot_dimension_numbers<[0], [0], [1], [1], [0, 1, 1, 1], [], []>} : vector<8x64xbf16>, vector<8x64xbf16>, vector<64x64xf32> -> vector<64x64xf32>
    %cst_36 = arith.constant dense<0xFF800000> : vector<64xf32>
    %87 = vector.multi_reduction <maximumf>, %86, %cst_36 [0] : vector<64x64xf32> to vector<64xf32>
    %88 = vector.shape_cast %87 : vector<64xf32> to vector<1x64xf32>
    %89 = vector.broadcast %88 : vector<1x64xf32> to vector<64x64xf32>
    %90 = arith.subf %86, %89 : vector<64x64xf32>
    %91 = math.exp %90 : vector<64x64xf32>
    %cst_37 = arith.constant dense<0.000000e+00> : vector<64xf32>
    %92 = vector.multi_reduction <add>, %91, %cst_37 [0] : vector<64x64xf32> to vector<64xf32>
    %93 = vector.shape_cast %92 : vector<64xf32> to vector<1x64xf32>
    %94 = tpu.reciprocal %93 {approx = true} : vector<1x64xf32> -> vector<1x64xf32>
    %95 = arith.truncf %91 : vector<64x64xf32> to vector<64x64xbf16>
    %cst_38 = arith.constant dense<0.000000e+00> : vector<8x64xf32>
    %96 = tpu.matmul %85, %95, %cst_38 {dimension_numbers = #tpu.dot_dimension_numbers<[1], [0], [0], [1], [0, 0, 1, 1], [], []>} : vector<8x64xbf16>, vector<64x64xbf16>, vector<8x64xf32> -> vector<8x64xf32>
    %97 = vector.broadcast %94 : vector<1x64xf32> to vector<8x64xf32>
    %98 = arith.mulf %96, %97 : vector<8x64xf32>
    %c24 = arith.constant 24 : index
    %c0_39 = arith.constant 0 : index
    %99 = vector.load %arg13[%c24, %c0_39] : memref<32x64xf32, #tpu.memory_space<vmem>>, vector<8x64xf32>
    tpu.vector_store %arg13[%c24, %c0_39], %98 {strides = array<i32>} : memref<32x64xf32, #tpu.memory_space<vmem>>, vector<8x64xf32>,
    %c0_40 = arith.constant 0 : index
    %c0_41 = arith.constant 0 : index
    %100 = vector.load %arg11[%c0_40, %c0_41] : memref<4x1xf32, #tpu.memory_space<vmem>>, vector<4x1xf32>
    %101 = vector.broadcast %100 : vector<4x1xf32> to vector<4x64xf32>
    %102 = arith.addf %1, %101 : vector<4x64xf32>
    %c0_42 = arith.constant 0 : index
    %c0_43 = arith.constant 0 : index
    %103 = vector.load %arg10[%c0_42, %c0_43] : memref<4x32xbf16, #tpu.memory_space<vmem>>, vector<4x32xbf16>
    %c0_44 = arith.constant 0 : index
    %c0_45 = arith.constant 0 : index
    %104 = vector.load %arg13[%c0_44, %c0_45] : memref<32x64xf32, #tpu.memory_space<vmem>>, vector<32x64xf32>
    %105 = arith.truncf %104 : vector<32x64xf32> to vector<32x64xbf16>
    %cst_46 = arith.constant dense<0.000000e+00> : vector<4x64xf32>
    %106 = tpu.matmul %103, %105, %cst_46 {dimension_numbers = #tpu.dot_dimension_numbers<[1], [0], [0], [1], [0, 0, 1, 1], [], []>} : vector<4x32xbf16>, vector<32x64xbf16>, vector<4x64xf32> -> vector<4x64xf32>
    %107 = arith.addf %102, %106 : vector<4x64xf32>
    %c0_47 = arith.constant 0 : index
    %c0_48 = arith.constant 0 : index
    %c0_49 = arith.constant 0 : index
    %108 = vector.load %arg12[%c0_47, %c0_48, %c0_49] : memref<1x4x64xf32, #tpu.memory_space<vmem>>, vector<1x4x64xf32>
    %109 = vector.shape_cast %108 : vector<1x4x64xf32> to vector<4x64xf32>
    %110 = vector.shape_cast %107 : vector<4x64xf32> to vector<1x4x64xf32>
    tpu.vector_store %arg12[%c0_47, %c0_48, %c0_49], %110 {strides = array<i32>} : memref<1x4x64xf32, #tpu.memory_space<vmem>>, vector<1x4x64xf32>,
    return
  }
  func.func @transform_0(%arg0: i32, %arg1: i32) -> (i32, i32, i32) {
    %c0_i32 = arith.constant 0 : i32
    %c0_i32_0 = arith.constant 0 : i32
    return %arg0, %c0_i32, %arg1 : i32, i32, i32
  }
  func.func @transform_1(%arg0: i32, %arg1: i32) -> (i32, i32, i32) {
    %c0_i32 = arith.constant 0 : i32
    %c0_i32_0 = arith.constant 0 : i32
    %c0_i32_1 = arith.constant 0 : i32
    return %arg0, %c0_i32, %c0_i32_0 : i32, i32, i32
  }
  func.func @transform_2(%arg0: i32, %arg1: i32) -> (i32, i32) {
    %c0_i32 = arith.constant 0 : i32
    %c0_i32_0 = arith.constant 0 : i32
    %c0_i32_1 = arith.constant 0 : i32
    return %c0_i32, %c0_i32_0 : i32, i32
  }
  func.func @transform_3(%arg0: i32, %arg1: i32) -> (i32, i32) {
    %c0_i32 = arith.constant 0 : i32
    %c0_i32_0 = arith.constant 0 : i32
    %c0_i32_1 = arith.constant 0 : i32
    return %c0_i32, %c0_i32_0 : i32, i32
  }
  func.func @transform_4(%arg0: i32, %arg1: i32) -> (i32, i32) {
    %c0_i32 = arith.constant 0 : i32
    %c0_i32_0 = arith.constant 0 : i32
    %c0_i32_1 = arith.constant 0 : i32
    return %c0_i32, %c0_i32_0 : i32, i32
  }
  func.func @transform_5(%arg0: i32, %arg1: i32) -> (i32, i32) {
    %c0_i32 = arith.constant 0 : i32
    %c0_i32_0 = arith.constant 0 : i32
    %c0_i32_1 = arith.constant 0 : i32
    return %c0_i32, %c0_i32_0 : i32, i32
  }
  func.func @transform_6(%arg0: i32, %arg1: i32) -> (i32, i32) {
    %c0_i32 = arith.constant 0 : i32
    %c0_i32_0 = arith.constant 0 : i32
    %c0_i32_1 = arith.constant 0 : i32
    return %c0_i32, %c0_i32_0 : i32, i32
  }
  func.func @transform_7(%arg0: i32, %arg1: i32) -> (i32, i32) {
    %c0_i32 = arith.constant 0 : i32
    %c0_i32_0 = arith.constant 0 : i32
    %c0_i32_1 = arith.constant 0 : i32
    return %c0_i32, %c0_i32_0 : i32, i32
  }
  func.func @transform_8(%arg0: i32, %arg1: i32) -> (i32, i32) {
    %c0_i32 = arith.constant 0 : i32
    %c0_i32_0 = arith.constant 0 : i32
    %c0_i32_1 = arith.constant 0 : i32
    return %c0_i32, %c0_i32_0 : i32, i32
  }
  func.func @transform_9(%arg0: i32, %arg1: i32) -> (i32, i32) {
    %c0_i32 = arith.constant 0 : i32
    %c0_i32_0 = arith.constant 0 : i32
    %c0_i32_1 = arith.constant 0 : i32
    return %c0_i32, %c0_i32_0 : i32, i32
  }
  func.func @transform_10(%arg0: i32, %arg1: i32) -> (i32, i32, i32) {
    %c0_i32 = arith.constant 0 : i32
    %c0_i32_0 = arith.constant 0 : i32
    return %arg0, %c0_i32, %arg1 : i32, i32, i32
  }
}

</mosaic_0001>

<bundles_post_ra>
// kernel: tpu_custom_call.1
= control target key start
LH: loop header
LB: loop body
LE: loop exit
PB: predicated region body
PF: predicated region fallthrough
CT: control target
= control target key end

     0   :  { %15 = vsyncpa [#allocation4], 0  ;;  %s2691_s0 = inlined_call_operand.vmem [shape: f32[2,4,64], index: 0, kind: input, shape index: {}]   ;;  %s2692_s1 = inlined_call_operand.vmem [shape: bf16[2,32,64], index: 1, kind: input, shape index: {}]   ;;  %s2693_s2 = inlined_call_operand.vmem [shape: bf16[32,4], index: 2, kind: input, shape index: {}]   ;;  %s2694_s3 = inlined_call_operand.vmem [shape: f32[32,1], index: 3, kind: input, shape index: {}]   ;;  %s2695_s4 = inlined_call_operand.vmem [shape: bf16[32,32], index: 4, kind: input, shape index: {}]   ;;  %s2696_s5 = inlined_call_operand.vmem [shape: f32[32,1], index: 5, kind: input, shape index: {}]   ;;  %s2697_s6 = inlined_call_operand.vmem [shape: bf16[32,32], index: 6, kind: input, shape index: {}]   ;;  %s2698_s7 = inlined_call_operand.vmem [shape: f32[32,1], index: 7, kind: input, shape index: {}]   ;;  %s2699_s8 = inlined_call_operand.vmem [shape: bf16[4,32], index: 8, kind: input, shape index: {}]   ;;  %s2700_s9 = inlined_call_operand.vmem [shape: f32[4,1], index: 9, kind: input, shape index: {}]   ;;  %s2701_s10 = inlined_call_operand.hbm [shape: f32[2,4,64], index: 10, kind: output, shape index: {}]  }
   0x1   :  { %17 = vsyncpa [#allocation4 + $0x1], 0  ;;  %s2231_s13 = smov 0   ;;  %s2233_s14 = smov 0  }
   0x2   :  { %s2235_s15 = smov 0   ;;  %s2237_s16 = smov 0  }
   0x3   :  { %s2239_s17 = smov 0   ;;  %s2241_s18 = smov 0  }
   0x4 LB: > { %2704 = sst [smem:[#allocation6_spill]] %s2166_s17  ;;  %s1725_s19 = sadd.s32 4294967295, %s2170_s18   ;;  %s2170_s18 = sphi %s2241_s18, %s23_s18   ;;  %s2166_s17 = sphi %s2239_s17, %s2711_s17   ;;  %s2162_s16 = sphi %s2237_s16, %s2710_s16   ;;  %s2158_s15 = sphi %s2235_s15, %s2714_s15   ;;  %s2154_s14 = sphi %s2233_s14, %s2713_s14   ;;  %s2150_s13 = sphi %s2231_s13, %s2712_s13  }
   0x5   : > { %s1726_s20 = sadd.s32 4294967294, %s2170_s18   ;;  %s35_s21 = sadd.s32 1, %s2166_s17 }
   0x6   : > { %s266_s22 = sadd.s32 1, %s2158_s15  ;;  %p37_p0 = scmp.ge.s32.totalorder %s35_s21, 2 }
   0x7   : > { %p276_p1 = scmp.ne.s32.totalorder %s2158_s15, %s2154_s14  ;;  %p277_p2 = scmp.eq.s32.totalorder %s1725_s19, 1 }
   0x8   : > { %p282_p3 = scmp.ne.s32.totalorder %s2154_s14, %s2150_s13  ;;  %s2716_s21 = smov (%p37_p0, %s35_s21), 0 }
   0x9   : > { %2705 = sst [smem:[#allocation7_spill]] %s2716_s21  ;;  %p2271_p4 = por %p277_p2, %p276_p1 }
   0xa   : > { %p283_p5 = scmp.eq.s32.totalorder %s1726_s20, 1  ;;  %s261_s24 = ssub.s32 %s2166_s17, %s2716_s21 }
   0xb   : > { %p1729_p6 = scmp.ge.s32.totalorder %s2170_s18, 1  ;;  %p264_p7 = scmp.eq.s32.totalorder %s261_s24, 0 }
   0xc   : > { %p2278_p8 = por %p283_p5, %p282_p3  ;;  %p343_p9 = scmp.lt.s32.totalorder %s2170_s18, 3 }
   0xd   : > { %s2284_s26 = scalar_select %p264_p7, %s2158_s15, %s266_s22  }
   0xe   : > { %p344_p10 = pnand %p1729_p6, %p343_p9 }
   0xf   : > { %2708 = sst [smem:[#allocation8_spill]] %s2284_s26  ;;  %p388_p11 = scmp.lt.s32.totalorder (!%p344_p10), %s2162_s16, 1  ;;  %v2013_v0 = vld [vmem:[%s2693_s2] sm:$0xff] (!%p344_p10)   ;;  %vm445_vm0 = vcmask (!%p344_p10), 31744   ;;  %vm555_vm1 = vcmask (!%p344_p10), 261120   ;;  %v2172_v3 = vmov (!%p344_p10), 0  }
  0x10   : > { %347 = sbr.rel (%p344_p10) target bundleno = 1143 (0x477), region = 60  ;;  %1830 = vmatprep.mubr.msk.bf16.mxu0 (!%p344_p10), %vm445_vm0, %v2013_v0  ;;  %v2015_v1 = vld [vmem:[%s2695_s4] sm:$0xff] (!%p344_p10)   ;;  %2009 = vset.pattern.permute.xlu0 (!%p344_p10), %v2172_v3  ;;  %v511_v4 = vld [vmem:[%s2696_s5 + $0x10] sm:$0xff] (!%p344_p10)  ;;  %vm452_vm2 = vcmask (!%p344_p10), 1041408   ;;  %v510_v9 = vld [vmem:[%s2696_s5 + $0x8] sm:$0xff] (!%p344_p10)  ;;  %vm736_vm3 = vcmask (!%p344_p10), 1043456  }
  0x11   : > { %v509_v2 = vld [vmem:[%s2696_s5] sm:$0xff] (!%p344_p10)  ;;  %1838 = vmatprep.mubr.msk.bf16.mxu1 (!%p344_p10), %vm555_vm1, %v2015_v1  ;;  %2010 = vset.pattern.permute.xlu1 (!%p344_p10), %v2172_v3  ;;  %v2014_v12 = vld [vmem:[%s2693_s2 + $0x8] sm:$0xff] (!%p344_p10)   ;;  %v512_v14 = vld [vmem:[%s2696_s5 + $0x18] sm:$0xff] (!%p344_p10)  ;;  %vm723_vm4 = vcmask (!%p344_p10), 64512   ;;  %vm2174_vm5 = vmmov (!%p344_p10), 0   ;;  %vm805_vm6 = vcmask (!%p344_p10), 523264  }
  0x12   : > { %515 = vperm.xlu0 (!%p344_p10), %2009, %v509_v2   ;;  %525 = vperm.xlu1 (!%p344_p10), %2010, %v511_v4   ;;  %v411_v10 = vld [vmem:[%s2694_s3] sm:$0xff] (!%p344_p10)  ;;  %v2016_v13 = vld [vmem:[%s2695_s4 + $0x8] sm:$0xff] (!%p344_p10)   ;;  %v413_v17 = vld [vmem:[%s2694_s3 + $0x10] sm:$0xff] (!%p344_p10)  ;;  %s1770_s30 = sshll.u32 (!%p344_p10), %s2162_s16, 6  ;;  %vm1625_vm7 = vcmask (!%p344_p10), 519168  }
  0x13   : > { %v412_v15 = vld [vmem:[%s2694_s3 + $0x8] sm:$0xff] (!%p344_p10)  ;;  %v2017_v16 = vld [vmem:[%s2697_s6] sm:$0xff] (!%p344_p10)   ;;  %v414_v19 = vld [vmem:[%s2694_s3 + $0x18] sm:$0xff] (!%p344_p10) }
  0x14   : > { %v2018_v18 = vld [vmem:[%s2697_s6 + $0x8] sm:$0xff] (!%p344_p10)   ;;  %v615_v48 = vld [vmem:[%s2698_s7] sm:$0xff] (!%p344_p10)  ;;  %v617_v50 = vld [vmem:[%s2698_s7 + $0x10] sm:$0xff] (!%p344_p10) }
  0x15   : > { %v616_v51 = vld [vmem:[%s2698_s7 + $0x8] sm:$0xff] (!%p344_p10)  ;;  %v618_v52 = vld [vmem:[%s2698_s7 + $0x18] sm:$0xff] (!%p344_p10)  ;;  %v1567_v55 = vld [vmem:[%s2700_s9] sm:$0xf] (!%p344_p10) }
  0x16   : > { %520 = vperm.xlu0 (!%p344_p10), %2009, %v510_v9   ;;  %417 = vperm.xlu1 (!%p344_p10), %2010, %v411_v10  }
  0x17   : > { %s389_s29 = scalar_select %p388_p11, %s2162_s16, 1 }
  0x19   : > { %s1773_s12 = sshll.u32 %s389_s29, 4  ;;  %s1731_s19 = sshll.u32 %s389_s29, 2 }
  0x1a   : > { %s399_s27 = scalar_lea.vmem %s2692_s1, %s1773_s12  ;;  %s2304_s26 = scalar_lea.vmem %s2691_s0, %s1731_s19  ;;  %530 = vperm.xlu0 %2009, %v512_v14   ;;  %422 = vperm.xlu1 %2010, %v412_v15  }
  0x1b   : > { %v2011_v5 = vld [vmem:[%s399_s27] sm:$0xff]   ;;  %v2012_v8 = vld [vmem:[%s399_s27 + $0x8] sm:$0xff]   ;;  %s385_s27 = sand.u32 1, %s2154_s14   ;;  %s2644_s12 = scalar_lea.hbm %s2701_s10, %s1770_s30 }
  0x1c   : > { %v401_v6 = vld [vmem:[%s2304_s26] sm:$0xf]  ;;  %1834 = vmatprep.subr.bf16.mxu1 %v2011_v5  ;;  %s1730_s28 = sshll.u32 %s385_s27, 2  ;;  %s1628_s16 = scalar_lea.sflag [#allocation4], %s385_s27 }
  0x1d   : > { %v410_v7 = vpack.c.bf16 %v401_v6, %v401_v6  ;;  %1835 = vmatpush3.bf16.msra.mxu1 %v2011_v5  ;;  %s387_s29 = scalar_lea.vmem [#allocation3], %s1730_s28  ;;  %s2175_s19 = smov [#allocation3]  }
  0x1e   : > { %1836 = vmatprep.subr.bf16.mxu1 %v2012_v8  ;;  %427 = vperm.xlu0 %2009, %v413_v17   ;;  %v2173_v17 = vmov 0.0   ;;  %s1642_s17 = sshll.u32 %s387_s29, 4  ;;  %s2096_s20 = sshll.u32 %s2175_s19, 4  ;;  %s2646_s17 = int_to_ptr.vmem [resolvable:$true] %s1642_s17  ;;  %s2097_s20 = int_to_ptr.vmem [resolvable:$false] %s2096_s20 }
  0x1f   : > { %1946 = vmatprep.subr.msk.bf16.mxu0 %vm452_vm2, %v410_v7  ;;  %v454_v11 = vsel %vm452_vm2, %v410_v7, 0  ;;  %s2098_s22 = scalar_lea.vmem %s2097_s20, 128  ;;  %p2099_p1 = scmp.lt.s32.totalorder %s2646_s17, %s2097_s20 }
  0x20   : > { %1829 = vmatpush3.bf16.msra.mxu0 %v454_v11 }
  0x21   : > { %1842 = vmatprep.subr.bf16.mxu0 %v2011_v5  ;;  %1837 = vmatpush3.bf16.msra.mxu1 %v2012_v8 }
  0x22   : > { %432 = vperm.xlu0 %2009, %v414_v19  }
  0x23   : > { %1831 = vmatmul.mubr.msk.bf16.vlgmr.msra.gmra.mrb[0].mxu0 %vm445_vm0, %v2014_v12 }
  0x24   : > { %1843 = vmatpush3.bf16.msra.mxu0 %v2011_v5  ;;  %1839 = vmatmul.mubr.msk.bf16.vlgmr.msra.gmra.mrb[0].mxu1 %vm555_vm1, %v2016_v13 }
  0x25   : > { %1844 = vmatprep.subr.bf16.mxu0 %v2012_v8  ;;  %1846 = vmatprep.mubr.msk.bf16.mxu0 %vm555_vm1, %v2017_v16 }
  0x28   : > { %1845 = vmatpush3.bf16.msra.mxu0 %v2012_v8 }
  0x29   : > { %1860 = vmatprep.subr.bf16.mxu0 %v2173_v17 }
  0x2b   : > { %1847 = vmatmul.mubr.msk.bf16.vlgmr.msra.gmra.mrb[4].mxu0 %vm555_vm1, %v2018_v18 }
  0x2c   : > { %1868 = vmatprep.mubr.msk.bf16.mxu0 %vm2174_vm5, %v2173_v17 }
  0x91   : > { %v526_v20 = vpop.permute.xlu1 %525  ;;  %v516_v22 = vpop.permute.xlu0 %515 }
  0x95   : > { %v418_v21 = vpop.permute.xlu1 %417  ;;  %v521_v35 = vpop.permute.xlu0 %520 }
  0x99   : > { %v423_v25 = vpop.permute.xlu1 %422  ;;  %v531_v43 = vpop.permute.xlu0 %530 }
  0x9d   : > { %v428_v56 = vpop.permute.xlu0 %427 }
  0xa1   : > { %v433_v59 = vpop.permute.xlu0 %432 }
  0xf6   : > { %v1832_v23 = vpop.f32.mrb[0].mxu0 }
  0xf7   : > { %v490_v24 = vpop.f32.mrb[1].mxu0  ;;  %v1840_v26 = vpop.f32.mrb[0].mxu1  ;;  %v499_v58 = vadd.f32 %v1832_v23, %v428_v56 }
  0xf8   : > { %v1833_v27 = vpop.f32.mrb[2].mxu0  ;;  %v491_v28 = vadd.f32 %v490_v24, %v418_v21  ;;  %v596_v29 = vpop.f32.mrb[1].mxu1  ;;  %v605_v42 = vadd.f32 %v1840_v26, %v526_v20 }
  0xf9   : > { %v493_v30 = vpop.f32.mrb[3].mxu0  ;;  %v597_v31 = vadd.f32 %v596_v29, %v516_v22  ;;  %v1841_v32 = vpop.f32.mrb[2].mxu1  ;;  %v1137_v61 = vpack.c.bf16 %v499_v58, %v499_v58  ;;  %v502_v3 = vadd.f32 %v1833_v27, %v433_v59 }
  0xfa   : > { %v704_v33 = vpack.c.bf16 %v491_v28, %v491_v28  ;;  %v494_v34 = vadd.f32 %v493_v30, %v423_v25  ;;  %v599_v36 = vpop.f32.mrb[3].mxu1  ;;  %v608_v44 = vadd.f32 %v1841_v32, %v531_v43  ;;  %v1138_v45 = vpack.c.bf16 %v605_v42, %v605_v42 }
  0xfb   : > { %v705_v37 = vpack.c.bf16 %v597_v31, %v597_v31  ;;  %v600_v38 = vadd.f32 %v599_v36, %v521_v35  ;;  %v1169_v5 = vsel %vm736_vm3, %v1137_v61, 0  ;;  %v1352_v6 = vpack.c.bf16 %v502_v3, %v502_v3 }
  0xfc   : > { %v738_v39 = vsel %vm736_vm3, %v704_v33, 0  ;;  %v922_v40 = vpack.c.bf16 %v494_v34, %v494_v34  ;;  %1947 = vmatprep.subr.msk.bf16.mxu1 %vm736_vm3, %v704_v33  ;;  %v1353_v46 = vpack.c.bf16 %v608_v44, %v608_v44 }
  0xfd   : > { %1851 = vmatpush3.bf16.msra.mxu1 %v738_v39  ;;  %v923_v41 = vpack.c.bf16 %v600_v38, %v600_v38  ;;  %707 = vxpose.xlu1.c.b16.start.end [1/1] (short) (narrow) %v705_v37, 64  ;;  %v1384_v11 = vsel %vm736_vm3, %v1352_v6, 0 }
  0xfe   : > { %1948 = vmatprep.subr.msk.bf16.mxu1 %vm736_vm3, %v922_v40  ;;  %v2348_v47 = vpop.f32.mrb[4].mxu0  ;;  %v954_v62 = vsel %vm736_vm3, %v922_v40, 0 }
  0xff   : > { %925 = vxpose.xlu0.c.b16.start.end [1/1] (short) (narrow) %v923_v41, 64  ;;  %v2353_v49 = vpop.f32.mrb[5].mxu0 }
 0x100   : > { %v2364_v53 = vpop.f32.mrb[6].mxu0 }
 0x101   : > { %v2366_v54 = vpop.f32.mrb[7].mxu0 }
 0x10a   : > { %1140 = vxpose.xlu1.c.b16.start.end [1/1] (short) (narrow) %v1138_v45, 64 }
 0x10c   : > { %1355 = vxpose.xlu0.c.b16.start.end [1/1] (short) (narrow) %v1353_v46, 64 }
 0x11a   : > { %621 = vperm.xlu1 %2010, %v615_v48  }
 0x11e   : > { %631 = vperm.xlu1 %2010, %v617_v50  }
 0x121   : > { %626 = vperm.xlu0 %2009, %v616_v51  }
 0x122   : > { %636 = vperm.xlu1 %2010, %v618_v52  }
 0x125   : > { %1570 = vperm.xlu0 %2009, %v1567_v55  }
 0x163   : > { %v715_v57 = vpop.trf.xlu1 }
 0x164   : > { %1852 = vmatprep.mubr.msk.bf16.mxu1 %vm723_vm4, %v715_v57 }
 0x165   : > { %v933_v63 = vpop.trf.xlu0 }
 0x167   : > { %v716_v60 = vpop.trf.xlu1 }
 0x168   : > { %1853 = vmatmul.mubr.msk.bf16.vlgmr.msra.gmra.mrb[4].mxu1 %vm723_vm4, %v716_v60 }
 0x169   : > { %1873 = vmatpush3.bf16.msra.mxu1 %v954_v62  ;;  %v934_v2 = vpop.trf.xlu0 }
 0x16a   : > { %1949 = vmatprep.subr.msk.bf16.mxu1 %vm736_vm3, %v1137_v61 }
 0x16b   : > { %v717_v0 = vpop.trf.xlu1 }
 0x16c   : > { %1856 = vmatprep.mubr.msk.bf16.mxu1 %vm723_vm4, %v717_v0 }
 0x16d   : > { %v935_v4 = vpop.trf.xlu0 }
 0x16f   : > { %v718_v1 = vpop.trf.xlu1 }
 0x170   : > { %1857 = vmatmul.mubr.msk.bf16.gmra.mrb[8].mxu1 %vm723_vm4, %v718_v1 }
 0x171   : > { %1874 = vmatprep.mubr.msk.bf16.mxu1 %vm723_vm4, %v933_v63  ;;  %v936_v8 = vpop.trf.xlu0 }
 0x173   : > { %v1148_v7 = vpop.trf.xlu1 }
 0x175   : > { %v1363_v12 = vpop.trf.xlu0 }
 0x177   : > { %v1149_v9 = vpop.trf.xlu1 }
 0x178   : > { %1875 = vmatmul.mubr.msk.bf16.vlgmr.msra.gmra.mrb[12].mxu1 %vm723_vm4, %v934_v2 }
 0x179   : > { %1895 = vmatpush3.bf16.msra.mxu1 %v1169_v5  ;;  %1878 = vmatprep.mubr.msk.bf16.mxu1 %vm723_vm4, %v935_v4  ;;  %v1364_v14 = vpop.trf.xlu0 }
 0x17a   : > { %1950 = vmatprep.subr.msk.bf16.mxu1 %vm736_vm3, %v1352_v6 }
 0x17b   : > { %v1150_v10 = vpop.trf.xlu1 }
 0x17d   : > { %v1365_v15 = vpop.trf.xlu0 }
 0x17f   : > { %v1151_v13 = vpop.trf.xlu1 }
 0x180   : > { %1879 = vmatmul.mubr.msk.bf16.gmra.mrb[16].mxu1 %vm723_vm4, %v936_v8 }
 0x181   : > { %1896 = vmatprep.mubr.msk.bf16.mxu1 %vm723_vm4, %v1148_v7  ;;  %v1366_v16 = vpop.trf.xlu0 }
 0x188   : > { %1897 = vmatmul.mubr.msk.bf16.vlgmr.msra.gmra.mrb[20].mxu1 %vm723_vm4, %v1149_v9 }
 0x189   : > { %1917 = vmatpush3.bf16.msra.mxu1 %v1384_v11  ;;  %1900 = vmatprep.mubr.msk.bf16.mxu1 %vm723_vm4, %v1150_v10 }
 0x18a   : > { %1938 = vmatprep.subr.bf16.mxu1 %v2173_v17 }
 0x190   : > { %1901 = vmatmul.mubr.msk.bf16.gmra.mrb[24].mxu1 %vm723_vm4, %v1151_v13 }
 0x191   : > { %1918 = vmatprep.mubr.msk.bf16.mxu1 %vm723_vm4, %v1363_v12 }
 0x198   : > { %1919 = vmatmul.mubr.msk.bf16.vlgmr.msra.gmra.mrb[28].mxu1 %vm723_vm4, %v1364_v14 }
 0x199   : > { %1922 = vmatprep.mubr.msk.bf16.mxu1 %vm723_vm4, %v1365_v15 }
 0x1a0   : > { %1923 = vmatmul.mubr.msk.bf16.gmra.mrb[32].mxu1 %vm723_vm4, %v1366_v16 }
 0x1a1   : > { %1942 = vmatprep.mubr.msk.bf16.mxu1 %vm2174_vm5, %v2173_v17 }
 0x23b   : > { %v1854_v18 = vpop.f32.mrb[4].mxu1 }
 0x23c   : > { %v774_v19 = vpop.f32.mrb[5].mxu1  ;;  %v808_v23 = vsel %vm805_vm6, %v1854_v18, -inf }
 0x23d   : > { %v1855_v20 = vpop.f32.mrb[6].mxu1  ;;  %v806_v26 = vsel %vm805_vm6, %v774_v19, -inf }
 0x23e   : > { %v777_v21 = vpop.f32.mrb[7].mxu1  ;;  %v809_v30 = vsel %vm805_vm6, %v1855_v20, -inf }
 0x23f   : > { %v807_v34 = vsel %vm805_vm6, %v777_v21, -inf }
 0x243   : > { %v2398_v22 = vpop.f32.mrb[8].mxu1 }
 0x244   : > { %v814_v24 = vsel %vm805_vm6, %v2398_v22, -inf  ;;  %v790_v25 = vpop.f32.mrb[9].mxu1 }
 0x245   : > { %v815_v27 = vmax.f32 %v808_v23, %v814_v24  ;;  %v810_v28 = vsel %vm805_vm6, %v790_v25, -inf  ;;  %v2405_v29 = vpop.f32.mrb[10].mxu1 }
 0x246   : > { %v811_v31 = vmax.f32 %v806_v26, %v810_v28  ;;  %v816_v32 = vsel %vm805_vm6, %v2405_v29, -inf  ;;  %v793_v33 = vpop.f32.mrb[11].mxu1 }
 0x247   : > { %v817_v35 = vmax.f32 %v809_v30, %v816_v32  ;;  %v812_v36 = vsel %vm805_vm6, %v793_v33, -inf }
 0x248   : > { %v813_v37 = vmax.f32 %v807_v34, %v812_v36 }
 0x249   : > { %v819_v38 = vmax.f32 %v815_v27, %v817_v35 }
 0x24a   : > { %v818_v39 = vmax.f32 %v811_v31, %v813_v37 }
 0x24b   : > { %v2412_v40 = vpop.f32.mrb[12].mxu1 }
 0x24c   : > { %v820_v41 = vmax.f32 %v818_v39, %v819_v38  ;;  %v2414_v42 = vpop.f32.mrb[13].mxu1  ;;  %v1023_v52 = vsel %vm805_vm6, %v2412_v40, -inf }
 0x24d   : > { %v2416_v43 = vpop.f32.mrb[14].mxu1  ;;  %v1021_v57 = vsel %vm805_vm6, %v2414_v42, -inf }
 0x24e   : > { %v821_v44 = vrot.slane %v820_v41, 4  ;;  %v2418_v45 = vpop.f32.mrb[15].mxu1  ;;  %v1024_v62 = vsel %vm805_vm6, %v2416_v43, -inf }
 0x24f   : > { %v1022_v2 = vsel %vm805_vm6, %v2418_v45, -inf }
 0x250   : > { %v822_v46 = vmax.f32 %v820_v41, %v821_v44 }
 0x252   : > { %v823_v48 = vrot.slane %v822_v46, 2 }
 0x253   : > { %v2420_v50 = vpop.f32.mrb[16].mxu1 }
 0x254   : > { %v824_v51 = vmax.f32 %v822_v46, %v823_v48  ;;  %v1029_v55 = vsel %vm805_vm6, %v2420_v50, -inf  ;;  %v2426_v56 = vpop.f32.mrb[17].mxu1 }
 0x255   : > { %v1030_v58 = vmax.f32 %v1023_v52, %v1029_v55  ;;  %v1025_v59 = vsel %vm805_vm6, %v2426_v56, -inf  ;;  %v2432_v60 = vpop.f32.mrb[18].mxu1 }
 0x256   : > { %v825_v61 = vrot.slane %v824_v51, 1  ;;  %v1026_v63 = vmax.f32 %v1021_v57, %v1025_v59  ;;  %v1031_v0 = vsel %vm805_vm6, %v2432_v60, -inf  ;;  %v2438_v1 = vpop.f32.mrb[19].mxu1 }
 0x257   : > { %v1032_v3 = vmax.f32 %v1024_v62, %v1031_v0  ;;  %v1027_v4 = vsel %vm805_vm6, %v2438_v1, -inf }
 0x258   : > { %v826_v5 = vmax.f32 %v824_v51, %v825_v61  ;;  %v1028_v6 = vmax.f32 %v1022_v2, %v1027_v4 }
 0x259   : > { %v1034_v7 = vmax.f32 %v1030_v58, %v1032_v3 }
 0x25a   : > { %v827_v8 = vsub.f32 %v774_v19, %v826_v5  ;;  %v828_v9 = vsub.f32 %v777_v21, %v826_v5  ;;  %v829_v10 = vsub.f32 %v1854_v18, %v826_v5  ;;  %v830_v11 = vsub.f32 %v1855_v20, %v826_v5 }
 0x25b   : > { %v831_v12 = vsub.f32 %v790_v25, %v826_v5  ;;  %v832_v13 = vsub.f32 %v793_v33, %v826_v5  ;;  %v833_v14 = vsub.f32 %v2398_v22, %v826_v5  ;;  %v1033_v15 = vmax.f32 %v1026_v63, %v1028_v6  ;;  %v2445_v16 = vpop.f32.mrb[20].mxu1 }
 0x25c   : > { %v835_v23 = vmul.f32 1.442695, %v827_v8  ;;  %v837_v24 = vmul.f32 1.442695, %v828_v9  ;;  %v839_v26 = vmul.f32 1.442695, %v829_v10  ;;  %v834_v27 = vsub.f32 %v2405_v29, %v826_v5 }
 0x25d   : > { %v841_v28 = vmul.f32 1.442695, %v830_v11  ;;  %v1035_v30 = vmax.f32 %v1033_v15, %v1034_v7  ;;  %v843_v31 = vmul.f32 1.442695, %v831_v12  ;;  %v2448_v19 = vpop.f32.mrb[21].mxu1  ;;  %v1238_v35 = vsel %vm805_vm6, %v2445_v16, -inf }
 0x25e   : > { %2019 = vpow2.f32 %v835_v23  ;;  %v845_v18 = vmul.f32 1.442695, %v832_v13  ;;  %v2450_v21 = vpop.f32.mrb[22].mxu1  ;;  %v847_v22 = vmul.f32 1.442695, %v833_v14  ;;  %v1236_v39 = vsel %vm805_vm6, %v2448_v19, -inf }
 0x25f   : > { %2021 = vpow2.f32 %v837_v24  ;;  %v1036_v20 = vrot.slane %v1035_v30, 4  ;;  %v2452_v25 = vpop.f32.mrb[23].mxu1  ;;  %v849_v34 = vmul.f32 1.442695, %v834_v27  ;;  %v1239_v48 = vsel %vm805_vm6, %v2450_v21, -inf }
 0x260   : > { %2023 = vpow2.f32 %v839_v26  ;;  %v1237_v51 = vsel %vm805_vm6, %v2452_v25, -inf }
 0x261   : > { %2025 = vpow2.f32 %v841_v28  ;;  %v1037_v32 = vmax.f32 %v1035_v30, %v1036_v20 }
 0x262   : > { %2027 = vpow2.f32 %v843_v31 }
 0x263   : > { %2029 = vpow2.f32 %v845_v18  ;;  %v1038_v29 = vrot.slane %v1037_v32, 2  ;;  %v2454_v33 = vpop.f32.mrb[24].mxu1 }
 0x264   : > { %2031 = vpow2.f32 %v847_v22  ;;  %v1244_v36 = vsel %vm805_vm6, %v2454_v33, -inf  ;;  %v2460_v37 = vpop.f32.mrb[25].mxu1 }
 0x265   : > { %v1039_v38 = vmax.f32 %v1037_v32, %v1038_v29  ;;  %v1245_v41 = vmax.f32 %v1238_v35, %v1244_v36  ;;  %v1240_v44 = vsel %vm805_vm6, %v2460_v37, -inf  ;;  %v2466_v46 = vpop.f32.mrb[26].mxu1  ;;  %2033 = vpow2.f32 %v849_v34 }
 0x266   : > { %v1241_v52 = vmax.f32 %v1236_v39, %v1240_v44  ;;  %v1246_v55 = vsel %vm805_vm6, %v2466_v46, -inf  ;;  %v2474_v57 = vpop.f32.mrb[27].mxu1 }
 0x267   : > { %v1040_v58 = vrot.slane %v1039_v38, 1  ;;  %v1247_v59 = vmax.f32 %v1239_v48, %v1246_v55  ;;  %v1242_v61 = vsel %vm805_vm6, %v2474_v57, -inf }
 0x268   : > { %v2020_v62 = vpop.eup %2019  ;;  %v1243_v63 = vmax.f32 %v1237_v51, %v1242_v61 }
 0x269   : > { %v2022_v0 = vpop.eup %2021  ;;  %v851_v2 = vsel %vm805_vm6, %v2020_v62, 0.0  ;;  %v2479_v3 = vmax.f32 %v1039_v38, %v1040_v58  ;;  %v1249_v4 = vmax.f32 %v1245_v41, %v1247_v59 }
 0x26a   : > { %v2024_v5 = vpop.eup %2023  ;;  %v852_v6 = vsel %vm805_vm6, %v2022_v0, 0.0  ;;  %v1248_v7 = vmax.f32 %v1241_v52, %v1243_v63  ;;  %v873_v8 = vpack.c.bf16 %v2022_v0, %v2020_v62 }
 0x26b   : > { %v2026_v9 = vpop.eup %2025  ;;  %v853_v10 = vadd.f32 %v852_v6, %v851_v2  ;;  %v1042_v11 = vsub.f32 %v2414_v42, %v2479_v3  ;;  %v1043_v12 = vsub.f32 %v2418_v45, %v2479_v3  ;;  %v2486_v13 = vpop.f32.mrb[28].mxu1  ;;  %v854_v15 = vsel %vm805_vm6, %v2024_v5, 0.0 }
 0x26c   : > { %v2488_v14 = vpop.eup %2027  ;;  %v1044_v23 = vsub.f32 %v2412_v40, %v2479_v3  ;;  %v1045_v24 = vsub.f32 %v2416_v43, %v2479_v3  ;;  %v1046_v26 = vsub.f32 %v2426_v56, %v2479_v3  ;;  %1861 = vmatpush3.bf16.msra.mxu0 %v873_v8  ;;  %v2497_v42 = vpop.f32.mrb[29].mxu1  ;;  %v856_v28 = vsel %vm805_vm6, %v2026_v9, 0.0 }
 0x26d   : > { %v2499_v27 = vpop.eup %2029  ;;  %v855_v45 = vadd.f32 %v854_v15, %v853_v10  ;;  %v1047_v30 = vsub.f32 %v2438_v1, %v2479_v3  ;;  %v1048_v40 = vsub.f32 %v2420_v50, %v2479_v3  ;;  %v2506_v31 = vpop.f32.mrb[30].mxu1  ;;  %1862 = vmatprep.subr.bf16.mxu0 %v2173_v17  ;;  %v858_v56 = vsel %vm805_vm6, %v2488_v14, 0.0 }
 0x26e   : > { %v2509_v43 = vpop.eup %2031  ;;  %v1050_v18 = vmul.f32 1.442695, %v1042_v11  ;;  %v1052_v20 = vmul.f32 1.442695, %v1043_v12  ;;  %v1250_v22 = vmax.f32 %v1248_v7, %v1249_v4  ;;  %v2513_v32 = vpop.f32.mrb[31].mxu1  ;;  %v860_v1 = vsel %vm805_vm6, %v2499_v27, 0.0 }
 0x26f   : > { %v857_v29 = vadd.f32 %v856_v28, %v855_v45  ;;  %v1054_v34 = vmul.f32 1.442695, %v1044_v23  ;;  %v1056_v50 = vmul.f32 1.442695, %v1045_v24  ;;  %v862_v35 = vsel %vm805_vm6, %v2509_v43, 0.0  ;;  %v2034_v39 = vpop.eup %2033 }
 0x270   : > { %2035 = vpow2.f32 %v1050_v18  ;;  %v1058_v36 = vmul.f32 1.442695, %v1046_v26  ;;  %v1060_v38 = vmul.f32 1.442695, %v1047_v30  ;;  %v1062_v44 = vmul.f32 1.442695, %v1048_v40 }
 0x271   : > { %v859_v41 = vadd.f32 %v858_v56, %v857_v29  ;;  %2037 = vpow2.f32 %v1052_v20  ;;  %v1251_v48 = vrot.slane %v1250_v22, 4  ;;  %v1453_v51 = vsel %vm805_vm6, %v2486_v13, -inf }
 0x272   : > { %2039 = vpow2.f32 %v1054_v34  ;;  %v1451_v52 = vsel %vm805_vm6, %v2497_v42, -inf  ;;  %v1454_v55 = vsel %vm805_vm6, %v2506_v31, -inf  ;;  %v874_v61 = vpack.c.bf16 %v2026_v9, %v2024_v5  ;;  %v622_v5 = vpop.permute.xlu1 %621 }
 0x273   : > { %v861_v58 = vadd.f32 %v860_v1, %v859_v41  ;;  %2041 = vpow2.f32 %v1056_v50  ;;  %v1252_v59 = vmax.f32 %v1250_v22, %v1251_v48  ;;  %v2525_v62 = vpop.f32.mrb[32].mxu1  ;;  %v875_v63 = vpack.c.bf16 %v2499_v27, %v2488_v14 }
 0x274   : > { %2043 = vpow2.f32 %v1058_v36  ;;  %v1459_v0 = vsel %vm805_vm6, %v2525_v62, -inf  ;;  %v2531_v2 = vpop.f32.mrb[33].mxu1  ;;  %v876_v4 = vpack.c.bf16 %v2034_v39, %v2509_v43  ;;  %1863 = vmatpush3.bf16.msra.mxu0 %v874_v61  ;;  %v1452_v9 = vsel %vm805_vm6, %v2513_v32, -inf }
 0x275   : > { %v863_v6 = vadd.f32 %v862_v35, %v861_v58  ;;  %2045 = vpow2.f32 %v1060_v38  ;;  %v1253_v7 = vrot.slane %v1252_v59, 2  ;;  %v1460_v8 = vmax.f32 %v1453_v51, %v1459_v0  ;;  %v2534_v10 = vpop.f32.mrb[34].mxu1  ;;  %1864 = vmatprep.subr.bf16.mxu0 %v2173_v17 }
 0x276   : > { %v1455_v11 = vsel %vm805_vm6, %v2531_v2, -inf  ;;  %v1461_v12 = vsel %vm805_vm6, %v2534_v10, -inf  ;;  %v2543_v14 = vpop.f32.mrb[35].mxu1  ;;  %v1049_v15 = vsub.f32 %v2432_v60, %v2479_v3  ;;  %2047 = vpow2.f32 %v1062_v44 }
 0x277   : > { %v1254_v23 = vmax.f32 %v1252_v59, %v1253_v7  ;;  %v1456_v24 = vmax.f32 %v1451_v52, %v1455_v11  ;;  %v1462_v26 = vmax.f32 %v1454_v55, %v1461_v12  ;;  %v1457_v27 = vsel %vm805_vm6, %v2543_v14, -inf }
 0x278   : > { %v1458_v45 = vmax.f32 %v1452_v9, %v1457_v27  ;;  %v1064_v28 = vmul.f32 1.442695, %v1049_v15  ;;  %v864_v30 = vsel %vm805_vm6, %v2034_v39, 0.0  ;;  %v690_v40 = vadd.f32 %v2353_v49, %v622_v5  ;;  %1865 = vmatpush3.bf16.msra.mxu0 %v875_v63 }
 0x279   : > { %v1255_v43 = vrot.slane %v1254_v23, 1  ;;  %v1464_v56 = vmax.f32 %v1460_v8, %v1462_v26  ;;  %v2551_v18 = vadd.f32 %v864_v30, %v863_v6  ;;  %1866 = vmatprep.subr.bf16.mxu0 %v2173_v17  ;;  %v627_v26 = vpop.permute.xlu0 %626 }
 0x27a   : > { %v2036_v20 = vpop.eup %2035  ;;  %v1463_v60 = vmax.f32 %v1456_v24, %v1458_v45  ;;  %2049 = vpow2.f32 %v1064_v28  ;;  %v706_v36 = vpack.c.bf16 %v690_v40, %v690_v40 }
 0x27b   : > { %v2038_v3 = vpop.eup %2037  ;;  %v1066_v22 = vsel %vm805_vm6, %v2036_v20, 0.0  ;;  %v1256_v29 = vmax.f32 %v1254_v23, %v1255_v43 }
 0x27c   : > { %v2040_v1 = vpop.eup %2039  ;;  %v1067_v34 = vsel %vm805_vm6, %v2038_v3, 0.0  ;;  %v1465_v50 = vmax.f32 %v1463_v60, %v1464_v56  ;;  %v1088_v35 = vpack.c.bf16 %v2038_v3, %v2036_v20  ;;  %1867 = vmatpush3.bf16.msra.mxu0 %v876_v4  ;;  %v693_v20 = vadd.f32 %v2366_v54, %v627_v26 }
 0x27d   : > { %v2042_v49 = vpop.eup %2041  ;;  %v1068_v38 = vadd.f32 %v1067_v34, %v1066_v22  ;;  %v1257_v39 = vsub.f32 %v2448_v19, %v1256_v29  ;;  %v1258_v41 = vsub.f32 %v2452_v25, %v1256_v29  ;;  %v1069_v48 = vsel %vm805_vm6, %v2040_v1, 0.0  ;;  %1882 = vmatprep.subr.bf16.mxu0 %v2173_v17 }
 0x27e   : > { %v2044_v44 = vpop.eup %2043  ;;  %v1259_v51 = vsub.f32 %v2445_v16, %v1256_v29  ;;  %v1260_v52 = vsub.f32 %v2450_v21, %v1256_v29  ;;  %v1261_v55 = vsub.f32 %v2460_v37, %v1256_v29  ;;  %v1262_v61 = vsub.f32 %v2474_v57, %v1256_v29 }
 0x27f   : > { %v2046_v58 = vpop.eup %2045  ;;  %v1070_v59 = vadd.f32 %v1069_v48, %v1068_v38  ;;  %v1263_v19 = vsub.f32 %v2454_v33, %v1256_v29  ;;  %v1071_v25 = vsel %vm805_vm6, %v2042_v49, 0.0  ;;  %v1265_v63 = vmul.f32 1.442695, %v1257_v39  ;;  %1869 = vmatmul.mubr.msk.bf16.vlgmr.msra.gmra.mrb[8].mxu0 %vm805_vm6, %v706_v36 }
 0x280   : > { %v1267_v0 = vmul.f32 1.442695, %v1258_v41  ;;  %v1466_v4 = vrot.slane %v1465_v50, 4  ;;  %v1073_v21 = vsel %vm805_vm6, %v2044_v44, 0.0  ;;  %v1269_v6 = vmul.f32 1.442695, %v1259_v51  ;;  %1883 = vmatpush3.bf16.msra.mxu0 %v1088_v35  ;;  %1890 = vmatprep.mubr.msk.bf16.mxu0 %vm2174_vm5, %v2173_v17  ;;  %v2048_v7 = vpop.eup %2047 }
 0x281   : > { %v1072_v16 = vadd.f32 %v1071_v25, %v1070_v59  ;;  %v1271_v37 = vmul.f32 1.442695, %v1260_v52  ;;  %v1075_v57 = vsel %vm805_vm6, %v2046_v58, 0.0  ;;  %2051 = vpow2.f32 %v1265_v63  ;;  %1884 = vmatprep.subr.bf16.mxu0 %v2173_v17 }
 0x282   : > { %v1273_v33 = vmul.f32 1.442695, %v1261_v55  ;;  %v1275_v8 = vmul.f32 1.442695, %v1262_v61  ;;  %2053 = vpow2.f32 %v1267_v0  ;;  %v1467_v9 = vmax.f32 %v1465_v50, %v1466_v4 }
 0x283   : > { %v1074_v5 = vadd.f32 %v1073_v21, %v1072_v16  ;;  %v1089_v11 = vpack.c.bf16 %v2042_v49, %v2040_v1  ;;  %2055 = vpow2.f32 %v1269_v6  ;;  %v1277_v15 = vmul.f32 1.442695, %v1263_v19 }
 0x284   : > { %v2050_v12 = vpop.eup %2049  ;;  %v1090_v23 = vpack.c.bf16 %v2046_v58, %v2044_v44  ;;  %v1264_v24 = vsub.f32 %v2466_v46, %v1256_v29  ;;  %2057 = vpow2.f32 %v1271_v37  ;;  %v1468_v45 = vrot.slane %v1467_v9, 2 }
 0x285   : > { %v1076_v27 = vadd.f32 %v1075_v57, %v1074_v5  ;;  %1885 = vmatpush3.bf16.msra.mxu0 %v1089_v11  ;;  %v1091_v28 = vpack.c.bf16 %v2050_v12, %v2048_v7  ;;  %v1077_v30 = vsel %vm805_vm6, %v2048_v7, 0.0  ;;  %2059 = vpow2.f32 %v1273_v33 }
 0x286   : > { %1886 = vmatprep.subr.bf16.mxu0 %v2173_v17  ;;  %v1279_v40 = vmul.f32 1.442695, %v1264_v24  ;;  %2061 = vpow2.f32 %v1275_v8  ;;  %v1469_v56 = vmax.f32 %v1467_v9, %v1468_v45  ;;  %v1079_v46 = vsel %vm805_vm6, %v2050_v12, 0.0  ;;  %v632_v9 = vpop.permute.xlu1 %631 }
 0x287   : > { %v1078_v43 = vadd.f32 %v1077_v30, %v1076_v27  ;;  %2063 = vpow2.f32 %v1277_v15  ;;  %v924_v1 = vpack.c.bf16 %v693_v20, %v693_v20 }
 0x288   : > { %v1470_v60 = vrot.slane %v1469_v56, 1  ;;  %2065 = vpow2.f32 %v1279_v40 }
 0x289   : > { %1887 = vmatpush3.bf16.msra.mxu0 %v1090_v23  ;;  %v2577_v3 = vadd.f32 %v1079_v46, %v1078_v43 }
 0x28a   : > { %1888 = vmatprep.subr.bf16.mxu0 %v2173_v17  ;;  %v1471_v22 = vmax.f32 %v1469_v56, %v1470_v60 }
 0x28b   : > { %v2052_v29 = vpop.eup %2051 }
 0x28c   : > { %v2054_v34 = vpop.eup %2053  ;;  %v1281_v50 = vsel %vm805_vm6, %v2052_v29, 0.0  ;;  %v1472_v35 = vsub.f32 %v2497_v42, %v1471_v22  ;;  %v1473_v54 = vsub.f32 %v2513_v32, %v1471_v22  ;;  %v1474_v49 = vsub.f32 %v2486_v13, %v1471_v22 }
 0x28d   : > { %1889 = vmatpush3.bf16.msra.mxu0 %v1091_v28  ;;  %v2056_v36 = vpop.eup %2055  ;;  %v1282_v38 = vsel %vm805_vm6, %v2054_v34, 0.0  ;;  %v1475_v39 = vsub.f32 %v2506_v31, %v1471_v22  ;;  %v1476_v41 = vsub.f32 %v2531_v2, %v1471_v22  ;;  %v1477_v44 = vsub.f32 %v2543_v14, %v1471_v22 }
 0x28e   : > { %1904 = vmatprep.subr.bf16.mxu0 %v2173_v17  ;;  %v2058_v48 = vpop.eup %2057  ;;  %v1283_v51 = vadd.f32 %v1282_v38, %v1281_v50  ;;  %v1478_v42 = vsub.f32 %v2525_v62, %v1471_v22  ;;  %v1480_v52 = vmul.f32 1.442695, %v1472_v35  ;;  %v1284_v13 = vsel %vm805_vm6, %v2056_v36, 0.0 }
 0x28f   : > { %v2060_v32 = vpop.eup %2059  ;;  %v1482_v55 = vmul.f32 1.442695, %v1473_v54  ;;  %v1484_v58 = vmul.f32 1.442695, %v1474_v49  ;;  %v1303_v59 = vpack.c.bf16 %v2054_v34, %v2052_v29  ;;  %v1486_v2 = vmul.f32 1.442695, %v1475_v39 }
 0x290   : > { %1891 = vmatmul.mubr.msk.bf16.vlgmr.msra.gmra.mrb[12].mxu0 %vm805_vm6, %v924_v1  ;;  %v2062_v31 = vpop.eup %2061  ;;  %v1285_v61 = vadd.f32 %v1284_v13, %v1283_v51  ;;  %2067 = vpow2.f32 %v1480_v52  ;;  %v1286_v19 = vsel %vm805_vm6, %v2058_v48, 0.0  ;;  %v1488_v62 = vmul.f32 1.442695, %v1476_v41 }
 0x291   : > { %1912 = vmatprep.mubr.msk.bf16.mxu0 %vm2174_vm5, %v2173_v17  ;;  %v2064_v14 = vpop.eup %2063  ;;  %2069 = vpow2.f32 %v1482_v55  ;;  %v1490_v25 = vmul.f32 1.442695, %v1477_v44  ;;  %1905 = vmatpush3.bf16.msra.mxu0 %v1303_v59  ;;  %v1288_v4 = vsel %vm805_vm6, %v2060_v32, 0.0  ;;  %v1492_v16 = vmul.f32 1.442695, %v1478_v42  ;;  %v637_v44 = vpop.permute.xlu1 %636 }
 0x292   : > { %v2066_v63 = vpop.eup %2065  ;;  %v1287_v0 = vadd.f32 %v1286_v19, %v1285_v61  ;;  %2071 = vpow2.f32 %v1484_v58  ;;  %1906 = vmatprep.subr.bf16.mxu0 %v2173_v17  ;;  %v1304_v21 = vpack.c.bf16 %v2058_v48, %v2056_v36  ;;  %v1305_v6 = vpack.c.bf16 %v2062_v31, %v2060_v32 }
 0x293   : > { %2073 = vpow2.f32 %v1486_v2  ;;  %v1306_v37 = vpack.c.bf16 %v2066_v63, %v2064_v14  ;;  %v1479_v57 = vsub.f32 %v2534_v10, %v1471_v22  ;;  %v1290_v33 = vsel %vm805_vm6, %v2062_v31, 0.0 }
 0x294   : > { %v1289_v7 = vadd.f32 %v1288_v4, %v1287_v0  ;;  %2075 = vpow2.f32 %v1488_v62  ;;  %v1292_v11 = vsel %vm805_vm6, %v2064_v14, 0.0  ;;  %v1294_v15 = vsel %vm805_vm6, %v2066_v63, 0.0 }
 0x295   : > { %2077 = vpow2.f32 %v1490_v25  ;;  %1907 = vmatpush3.bf16.msra.mxu0 %v1304_v21  ;;  %v1494_v5 = vmul.f32 1.442695, %v1479_v57  ;;  %v698_v10 = vadd.f32 %v2348_v47, %v632_v9  ;;  %v701_v52 = vadd.f32 %v2364_v53, %v637_v44 }
 0x296   : > { %v1291_v8 = vadd.f32 %v1290_v33, %v1289_v7  ;;  %2079 = vpow2.f32 %v1492_v16  ;;  %1908 = vmatprep.subr.bf16.mxu0 %v2173_v17  ;;  %v866_v13 = vrot.slane %v2551_v18, 4  ;;  %v1081_v61 = vrot.slane %v2577_v3, 4 }
 0x297   : > { %2081 = vpow2.f32 %v1494_v5  ;;  %v1139_v20 = vpack.c.bf16 %v698_v10, %v698_v10  ;;  %v1354_v32 = vpack.c.bf16 %v701_v52, %v701_v52 }
 0x298   : > { %v1293_v12 = vadd.f32 %v1292_v11, %v1291_v8  ;;  %v867_v55 = vadd.f32 %v866_v13, %v2551_v18  ;;  %v1082_v14 = vadd.f32 %v1081_v61, %v2577_v3 }
 0x299   : > { %1909 = vmatpush3.bf16.msra.mxu0 %v1305_v6 }
 0x29a   : > { %v2068_v23 = vpop.eup %2067  ;;  %1910 = vmatprep.subr.bf16.mxu0 %v2173_v17  ;;  %v2604_v24 = vadd.f32 %v1294_v15, %v1293_v12  ;;  %v868_v58 = vrot.slane %v867_v55, 2  ;;  %v1083_v53 = vrot.slane %v1082_v14, 2 }
 0x29b   : > { %v2070_v26 = vpop.eup %2069  ;;  %v1496_v27 = vsel %vm805_vm6, %v2068_v23, 0.0 }
 0x29c   : > { %v2072_v45 = vpop.eup %2071  ;;  %v1497_v28 = vsel %vm805_vm6, %v2070_v26, 0.0  ;;  %v1518_v30 = vpack.c.bf16 %v2070_v26, %v2068_v23  ;;  %v869_v59 = vadd.f32 %v868_v58, %v867_v55  ;;  %v1084_v19 = vadd.f32 %v1083_v53, %v1082_v14 }
 0x29d   : > { %v2074_v40 = vpop.eup %2073  ;;  %v1498_v43 = vadd.f32 %v1497_v28, %v1496_v27  ;;  %1911 = vmatpush3.bf16.msra.mxu0 %v1306_v37  ;;  %v1499_v46 = vsel %vm805_vm6, %v2072_v45, 0.0  ;;  %v1296_v25 = vrot.slane %v2604_v24, 4 }
 0x29e   : > { %v2076_v56 = vpop.eup %2075  ;;  %1926 = vmatprep.subr.bf16.mxu0 %v2173_v17  ;;  %v1519_v47 = vpack.c.bf16 %v2074_v40, %v2072_v45  ;;  %v1501_v1 = vsel %vm805_vm6, %v2074_v40, 0.0  ;;  %v870_v31 = vrot.slane %v869_v59, 1  ;;  %v1085_v62 = vrot.slane %v1084_v19, 1 }
 0x29f   : > { %v2078_v60 = vpop.eup %2077  ;;  %v1500_v22 = vadd.f32 %v1499_v46, %v1498_v43  ;;  %v1503_v54 = vsel %vm805_vm6, %v2076_v56, 0.0  ;;  %v1297_v37 = vadd.f32 %v1296_v25, %v2604_v24 }
 0x2a0   : > { %v2080_v29 = vpop.eup %2079  ;;  %1913 = vmatmul.mubr.msk.bf16.vlgmr.msra.gmra.mrb[16].mxu0 %vm805_vm6, %v1139_v20  ;;  %v1520_v34 = vpack.c.bf16 %v2078_v60, %v2076_v56  ;;  %v1505_v38 = vsel %vm805_vm6, %v2078_v60, 0.0  ;;  %v871_v2 = vadd.f32 %v870_v31, %v869_v59  ;;  %v1086_v18 = vadd.f32 %v1085_v62, %v1084_v19 }
 0x2a1   : > { %v1502_v50 = vadd.f32 %v1501_v1, %v1500_v22  ;;  %1927 = vmatpush3.bf16.msra.mxu0 %v1518_v30  ;;  %1934 = vmatprep.mubr.msk.bf16.mxu0 %vm2174_vm5, %v2173_v17  ;;  %v2082_v35 = vpop.eup %2081  ;;  %v1507_v41 = vsel %vm805_vm6, %v2080_v29, 0.0  ;;  %v1298_v7 = vrot.slane %v1297_v37, 2 }
 0x2a2   : > { %1928 = vmatprep.subr.bf16.mxu0 %v2173_v17  ;;  %v1521_v36 = vpack.c.bf16 %v2082_v35, %v2080_v29  ;;  %v1509_v51 = vsel %vm805_vm6, %v2082_v35, 0.0  ;;  %2083 = vrcp.f32 %v871_v2 }
 0x2a3   : > { %v1504_v49 = vadd.f32 %v1503_v54, %v1502_v50  ;;  %2085 = vrcp.f32 %v1086_v18  ;;  %v1299_v3 = vadd.f32 %v1298_v7, %v1297_v37 }
 0x2a5   : > { %v1506_v39 = vadd.f32 %v1505_v38, %v1504_v49  ;;  %1929 = vmatpush3.bf16.msra.mxu0 %v1519_v47  ;;  %v1300_v57 = vrot.slane %v1299_v3, 1  ;;  %v1571_v38 = vpop.permute.xlu0 %1570 }
 0x2a6   : > { %1930 = vmatprep.subr.bf16.mxu0 %v2173_v17 }
 0x2a7   : > { %v1508_v48 = vadd.f32 %v1507_v41, %v1506_v39  ;;  %v1301_v23 = vadd.f32 %v1300_v57, %v1299_v3  ;;  %v2091_v39 = vld [vmem:[%s2304_s26] sm:$0xf]  ;;  %s2092_s26 = scalar_lea.vmem %s2646_s17, 64 }
 0x2a8   : > { %v1573_v41 = vadd.f32 %v2091_v39, %v1571_v38  ;;  %p2093_p12 = scmp.ne.s32.totalorder %s2646_s17, %s2092_s26  ;;  %p2100_p2 = scmp.lt.s32.totalorder %s2098_s22, %s2092_s26 }
 0x2a9   : > { %1931 = vmatpush3.bf16.msra.mxu0 %v1520_v34  ;;  %v1510_v42 = vadd.f32 %v1509_v51, %v1508_v48  ;;  %2087 = vrcp.f32 %v1301_v23 }
 0x2aa   : > { %1932 = vmatprep.subr.bf16.mxu0 %v2173_v17  ;;  %p2094_p13 = pnand %p2093_p12, %p2271_p4  ;;  %p2101_p3 = por %p2100_p2, %p2099_p1 }
 0x2ab   : > { %v1511_v33 = vrot.slane %v1510_v42, 4 }
 0x2ac   : > { %v2084_v63 = vpop.eup %2083  ;;  %p2095_p0 = pneg %p2094_p13 }
 0x2ad   : > { %1933 = vmatpush3.bf16.msra.mxu0 %v1521_v36  ;;  %v2086_v8 = vpop.eup %2085  ;;  %v1512_v10 = vadd.f32 %v1511_v33, %v1510_v42  ;;  %v1574_v36 = vld [vmem:[%s2699_s8] sm:$0x3] }
 0x2ae   : > { %p2102_p5 = pnand %p2101_p3, %p2095_p0 }
 0x2af   : > { %v1513_v26 = vrot.slane %v1512_v10, 2 }
 0x2b0   : > { %1935 = vmatmul.mubr.msk.bf16.vlgmr.msra.gmra.mrb[20].mxu0 %vm805_vm6, %v1354_v32 }
 0x2b1   : > { %v1514_v28 = vadd.f32 %v1513_v26, %v1512_v10 }
 0x2b3   : > { %v1515_v30 = vrot.slane %v1514_v28, 1  ;;  %v2088_v40 = vpop.eup %2087 }
 0x2b5   : > { %v1516_v47 = vadd.f32 %v1515_v30, %v1514_v28 }
 0x2b7   : > { %2089 = vrcp.f32 %v1516_v47 }
 0x2c1   : > { %v2090_v22 = vpop.eup %2089 }
 0x352   : > { %v914_v0 = vpop.f32.mrb[8].mxu0 }
 0x353   : > { %v920_v4 = vmul.f32 %v2084_v63, %v914_v0  ;;  %v1870_v16 = vpop.f32.mrb[9].mxu0 }
 0x354   : > { %v917_v21 = vpop.f32.mrb[10].mxu0 }
 0x355   : > { %921 = vst.msk [vmem:[#allocation2] sm:$0xff] %vm805_vm6, %v920_v4  ;;  %v1871_v6 = vpop.f32.mrb[11].mxu0 }
 0x35c   : > { %v1575_v27 = vld [vmem:[#allocation2] sm:$0xff] }
 0x363   : > { %v1129_v5 = vpop.f32.mrb[12].mxu0 }
 0x364   : > { %v1135_v9 = vmul.f32 %v2086_v8, %v1129_v5  ;;  %v1892_v11 = vpop.f32.mrb[13].mxu0 }
 0x365   : > { %v1132_v12 = vpop.f32.mrb[14].mxu0 }
 0x366   : > { %1136 = vst.msk [vmem:[#allocation2 + $0x8] sm:$0xff] %vm805_vm6, %v1135_v9  ;;  %v1893_v15 = vpop.f32.mrb[15].mxu0 }
 0x36d   : > { %v1576_v45 = vld [vmem:[#allocation2 + $0x8] sm:$0xff] }
 0x36e   : > { %v1579_v24 = vpack.c.bf16 %v1576_v45, %v1575_v27 }
 0x370   : > { %1939 = vmatpush3.bf16.msra.mxu1 %v1579_v24 }
 0x371   : > { %1940 = vmatprep.subr.bf16.mxu1 %v2173_v17 }
 0x373   : > { %v1344_v43 = vpop.f32.mrb[16].mxu0 }
 0x374   : > { %v1350_v56 = vmul.f32 %v2088_v40, %v1344_v43  ;;  %v1914_v20 = vpop.f32.mrb[17].mxu0 }
 0x375   : > { %v1347_v46 = vpop.f32.mrb[18].mxu0 }
 0x376   : > { %1351 = vst.msk [vmem:[#allocation2 + $0x10] sm:$0xff] %vm805_vm6, %v1350_v56  ;;  %v1915_v60 = vpop.f32.mrb[19].mxu0 }
 0x37d   : > { %v1577_v35 = vld [vmem:[#allocation2 + $0x10] sm:$0xff] }
 0x383   : > { %v1559_v29 = vpop.f32.mrb[20].mxu0 }
 0x384   : > { %v1565_v1 = vmul.f32 %v2090_v22, %v1559_v29  ;;  %v1936_v34 = vpop.f32.mrb[21].mxu0 }
 0x385   : > { %v1562_v50 = vpop.f32.mrb[22].mxu0 }
 0x386   : > { %1566 = vst.msk [vmem:[#allocation2 + $0x18] sm:$0xff] %vm805_vm6, %v1565_v1  ;;  %v1937_v17 = vpop.f32.mrb[23].mxu0 }
 0x38d   : > { %v1578_v54 = vld [vmem:[#allocation2 + $0x18] sm:$0xff] }
 0x38e   : > { %v1580_v49 = vpack.c.bf16 %v1578_v54, %v1577_v35 }
 0x390   : > { %1941 = vmatpush3.bf16.msra.mxu1 %v1580_v49 }
 0x393   : > { %1943 = vmatmul.mubr.msk.bf16.vlgmr.msra.gmra.mrb[36].mxu1 %vm555_vm1, %v1574_v36 }
 0x466   : > { %v1618_v44 = vpop.f32.mrb[36].mxu1 }
 0x467   : > { %v1624_v48 = vadd.f32 %v1618_v44, %v1573_v41  ;;  %v1944_v51 = vpop.f32.mrb[37].mxu1 }
 0x468   : > { %v1621_v42 = vpop.f32.mrb[38].mxu1 }
 0x469   : > { %v1945_v52 = vpop.f32.mrb[39].mxu1  ;;  %1626 = vst.msk [vmem:[%s387_s29] sm:$0xf] %vm1625_vm7, %v1624_v48 }
 0x46a   : > { %2105 = shalt.err (!%p2102_p5)
}
 0x46b   : > { %s2106_s24 = scalar_lea.hbm %s2644_s12, 64  ;;  %s2110_s30 = scalar_lea.hbm %s2701_s10, 128 }
 0x46c   : > { %p2107_p6 = scmp.ne.s32.totalorder %s2644_s12, %s2106_s24  ;;  %p2111_p10 = scmp.lt.u32.totalorder %s2644_s12, %s2701_s10 }
 0x46d   : > { %p2112_p11 = scmp.lt.u32.totalorder %s2110_s30, %s2106_s24  ;;  %p2114_p13 = scmp.lt.u32.totalorder %s2106_s24, %s2644_s12 }
 0x46e   : > { %p2108_p7 = pnand %p2107_p6, %p2271_p4 }
 0x46f   : > { %p2113_p12 = por %p2112_p11, %p2111_p10 }
 0x470   : > { %p2109_p9 = pneg %p2108_p7 }
 0x471   : > { %p2115_p0 = por %p2114_p13, %p2113_p12 }
 0x473   : > { %p2116_p1 = pnand %p2115_p0, %p2109_p9 }
 0x475   : > { %2119 = shalt.err (!%p2116_p1)
}
 0x476   : > { %1951 = dma.vmem_to_hbm [thread:$0]  (%p2271_p4), %s2646_s17, 64, %s2644_s12, %s1628_s16  }
 0x477 PF: > { %p1957_p2 = scmp.ge.s32.totalorder %s2170_s18, 2  ;;  %s1654_s11 = sand.u32 1, %s2150_s13  }
 0x478   : > { %s1655_s26 = scalar_lea.sflag [#allocation4], %s1654_s11 }
 0x479   : > { %p1954_p3 = pnand %p1957_p2, %p2278_p8 }
 0x47b   : > { %2145 = dma.done.wait (!%p1954_p3), %s1655_s26, 64  }
 0x47c   : > { %2147 = vsyncadd (!%p1954_p3), %s1655_s26, 4294967232  ;;  %s23_s18 = sadd.s32 1, %s2170_s18   ;;  %s2709_s23 = sld [smem:[#allocation8_spill]] }
 0x47d   : > { %p20_p5 = scmp.ge.s32.totalorder %s23_s18, 4   ;;  %s2710_s16 = sld [smem:[#allocation6_spill]] }
 0x47e   : > { %s2711_s17 = sld [smem:[#allocation7_spill]]  ;;  %s2712_s13 = smov %s2154_s14 }
 0x47f   : > { %s2713_s14 = smov %s2158_s15  ;;  %22 = sbr.rel (!%p20_p5) target bundleno = 4 (0x4), region = 98 }
 0x482   : > { %s2714_s15 = smov %s2709_s23 }
 0x486   :  { %1660 = vsyncpa [#allocation4], 1 }
 0x487   :  { %1662 = vsyncpa [#allocation4 + $0x1], 1 }

</bundles_post_ra>
